<compile_context>
chip_gen: v7x
topology: tpu7x:2x2x1
jax: 0.10.0
libtpu: 0.0.40
codegen_flags: <defaults>
</compile_context>

<pallas_src>
import jax
import jax.numpy as jnp
from jax.experimental import pallas as pl
from jax.experimental.pallas import tpu as pltpu


def _leaky(v):
    # nn.LeakyReLU(0.01), evaluated in f32 on the VPU.
    return jnp.where(v >= 0, v, 0.01 * v)


def _leaky_twice(v):
    # leaky(leaky(v)) fused into a single select (negative slope 0.01*0.01).
    return jnp.where(v >= 0, v, 1e-4 * v)


def _round_up(x, m):
    return (x + m - 1) // m * m


def _tpu_generation():
    """Best-effort TPU generation from device_kind; 0 if unknown."""
    try:
        kind = jax.devices()[0].device_kind.lower()
    except Exception:
        return 0
    for g in (7, 6, 5, 4, 3, 2):
        if f"v{g}" in kind or f"tpu{g}" in kind:
            return g
    return 0


def dendritic_ann_kernel(x_ref, w_in_ref, b_in_ref, w_dend_ref, soma_ref,
                         w_out_ref, b_out_ref, out_ref, h_ref):
    """One (batch-block, hidden-layer) grid step.

    Grid = (num_batch_blocks, num_hidden_layers).  The layer axis is
    'arbitrary' (sequential) so the hidden state h_ref (VMEM scratch, f32)
    carries across it; per-layer weight slabs are auto-pipelined by BlockSpec.
    """
    l = pl.program_id(1)
    num_d = soma_ref.shape[1]      # D     (static)
    h_cols = h_ref.shape[1]        # H_p   (static)

    # Input linear + LeakyReLU, only on the first layer step of a batch block.
    @pl.when(l == 0)
    def _():
        h_ref[...] = _leaky(
            jnp.dot(x_ref[...], w_in_ref[...],
                    preferred_element_type=jnp.float32) + b_in_ref[...])

    # Hidden dendritic layer `l` (d-major fused dendrite columns):
    #   dend[:, d*H_p + n] = leaky( h @ Wd[l][:, d*H_p + n] )       (MXU)
    #   neuron[:, n]       = leaky( sum_d dend[:, d*H_p+n]*soma[l,d,n] ) (VPU FMAs)
    #   h                  = leaky(neuron)      -> fused into _leaky_twice
    dend = _leaky(jnp.dot(h_ref[...].astype(jnp.bfloat16), w_dend_ref[0],
                          preferred_element_type=jnp.float32))   # (tb, D*H_p) f32
    soma = soma_ref[0]                                            # (D, H_p) f32
    acc = dend[:, 0:h_cols] * soma[0:1, :]
    for d in range(1, num_d):
        acc = acc + dend[:, d * h_cols:(d + 1) * h_cols] * soma[d:d + 1, :]
    h_ref[...] = _leaky_twice(acc)

    # Output linear (no activation), only after the last hidden layer.
    @pl.when(l == pl.num_programs(1) - 1)
    def _():
        out_ref[...] = (
            jnp.dot(h_ref[...].astype(jnp.bfloat16), w_out_ref[...],
                    preferred_element_type=jnp.float32) + b_out_ref[...])


def prepare_kernel_params(module_params):
    """Pad to lane-dense shapes, pre-transpose for x@W, reorder the fused
    dendritic weights d-major, and cast matmul weights to bf16 (biases and
    soma stay f32).

    module_params (PyTorch layout):
      w_in (H, IN), b_in (H,)
      w_dend (L, H, D, H)  -- per layer / per neuron dendritic weights (D, H_in)
      soma   (L, H, D)
      w_out (OUT, H), b_out (OUT,)
    """
    w_in, b_in, w_dend, soma, w_out, b_out = module_params
    Hh, IN = w_in.shape
    L, _, D, _ = w_dend.shape
    OUT = w_out.shape[0]

    IN_p = _round_up(IN, 128)
    H_p = _round_up(Hh, 128)
    OUT_p = _round_up(OUT, 128)
    HD_p = H_p * D

    # Input linear.  Padded rows/cols/bias are zero -> leaky(0)=0 keeps all
    # padded hidden units identically zero through every layer.
    w_in_p = jnp.zeros((IN_p, H_p), jnp.float32).at[:IN, :Hh].set(w_in.T)
    b_in_p = jnp.zeros((1, H_p), jnp.float32).at[0, :Hh].set(b_in)

    # Fused dendritic weights, d-major columns: (L, H_in_p, D*H_p) with
    # w_dend_p[l, i, d*H_p + n] = w_dend[l, n, d, i].  Real neurons occupy the
    # first Hh lanes of every d-block; padded lanes are zero.
    wd4 = jnp.zeros((L, H_p, D, H_p), jnp.float32)
    wd4 = wd4.at[:, :Hh, :, :Hh].set(jnp.transpose(w_dend, (0, 3, 2, 1)))
    w_dend_p = wd4.reshape(L, H_p, HD_p)

    # Soma as a tiny f32 (L, D, H_p) array: soma_p[l, d, n] = soma[l, n, d].
    soma_p = jnp.zeros((L, D, H_p), jnp.float32)
    soma_p = soma_p.at[:, :, :Hh].set(jnp.transpose(soma, (0, 2, 1)))

    # Output linear (padded output columns are exactly zero; sliced off later).
    w_out_p = jnp.zeros((H_p, OUT_p), jnp.float32).at[:Hh, :OUT].set(w_out.T)
    b_out_p = jnp.zeros((1, OUT_p), jnp.float32).at[0, :OUT].set(b_out)

    return dict(
        w_in=w_in_p.astype(jnp.bfloat16),
        b_in=b_in_p,
        w_dend=w_dend_p.astype(jnp.bfloat16),
        soma=soma_p,
        w_out=w_out_p.astype(jnp.bfloat16),
        b_out=b_out_p,
        sizes=(IN, Hh, OUT, L, D, IN_p, H_p, OUT_p, HD_p),
    )


def dendritic_ann_forward(x, kparams, *, batch_tile=None):
    """x: (B, C, H, W). Returns (B, output_size) float32."""
    IN, Hh, OUT, L, D, IN_p, H_p, OUT_p, HD_p = kparams["sizes"]
    assert L >= 1, "kernel expects at least one hidden layer"

    gen = _tpu_generation()
    if batch_tile is None:
        # v5e MXU is 128x128 (128 native); v6e/v7x MXU is 2x256x256 -> 256.
        batch_tile = 128 if gen == 5 else 256

    B = x.shape[0]
    x2d = x.reshape(B, -1)
    assert x2d.shape[1] == IN

    # Pad batch to a sublane-friendly tile and features to lane-dense widths.
    tb = min(batch_tile, _round_up(B, 8))
    B_p = _round_up(B, tb)
    nb = B_p // tb
    # v7x has 2 TensorCores; keep >= 2 blocks on the 'parallel' axis if possible.
    if gen >= 7 and nb == 1 and tb >= 16:
        tb = _round_up(tb // 2, 8)
        B_p = _round_up(B, tb)
        nb = B_p // tb

    x_p = jnp.zeros((B_p, IN_p), jnp.bfloat16).at[:B, :IN].set(
        x2d.astype(jnp.bfloat16))

    # Deeper weight prefetch on v5e, where per-layer slab DMA is exposed.
    wd_bufs = 3 if gen == 5 else 2
    wd_kwargs = {}
    if wd_bufs != 2 and hasattr(pl, "Buffered"):
        wd_kwargs["pipeline_mode"] = pl.Buffered(wd_bufs)

    # VMEM budget from the actual block shapes (double/triple buffered),
    # capped per generation (v7x / unknown: 48 MiB; v5e/v6e: 100 MiB).
    vmem_need = (
        2 * tb * IN_p * 2                         # x block (bf16)
        + 2 * (IN_p * H_p * 2 + H_p * 4)          # w_in + b_in
        + wd_bufs * H_p * HD_p * 2                # w_dend[l] slab
        + 2 * D * H_p * 4                         # soma[l]
        + 2 * (H_p * OUT_p * 2 + OUT_p * 4)       # w_out + b_out
        + 2 * tb * OUT_p * 4                      # out block
        + tb * H_p * 4)                           # hidden-state scratch
    vmem_cap = (100 << 20) if gen in (5, 6) else (48 << 20)
    vmem_limit = int(min(vmem_cap, max(32 << 20, vmem_need * 3 // 2)))

    # Cost estimate: per-layer slabs are re-streamed once per batch block
    # (b-outer / l-inner grid); constant-index blocks are fetched once.
    flops = 2 * B_p * (IN_p * H_p + L * (H_p * HD_p + D * H_p) + H_p * OUT_p)
    bytes_accessed = (
        B_p * IN_p * 2
        + IN_p * H_p * 2 + H_p * 4
        + H_p * OUT_p * 2 + OUT_p * 4
        + nb * L * (H_p * HD_p * 2 + D * H_p * 4)
        + B_p * OUT_p * 4)
    cost = pl.CostEstimate(flops=flops, transcendentals=0,
                           bytes_accessed=bytes_accessed)

    cp_cls = getattr(pltpu, "CompilerParams", None)
    if cp_cls is None:  # older naming fallback
        cp_cls = getattr(pltpu, "TPUCompilerParams")
    compiler_params = cp_cls(
        dimension_semantics=("parallel", "arbitrary"),
        vmem_limit_bytes=vmem_limit,
    )

    out_p = pl.pallas_call(
        dendritic_ann_kernel,
        out_shape=jax.ShapeDtypeStruct((B_p, OUT_p), jnp.float32),
        grid_spec=pltpu.PrefetchScalarGridSpec(
            num_scalar_prefetch=0,
            grid=(nb, L),
            in_specs=[
                pl.BlockSpec((tb, IN_p), lambda b, l: (b, 0)),          # x
                pl.BlockSpec((IN_p, H_p), lambda b, l: (0, 0)),         # w_in
                pl.BlockSpec((1, H_p), lambda b, l: (0, 0)),            # b_in
                pl.BlockSpec((1, H_p, HD_p), lambda b, l: (l, 0, 0),    # w_dend[l]
                             **wd_kwargs),
                pl.BlockSpec((1, D, H_p), lambda b, l: (l, 0, 0)),      # soma[l]
                pl.BlockSpec((H_p, OUT_p), lambda b, l: (0, 0)),        # w_out
                pl.BlockSpec((1, OUT_p), lambda b, l: (0, 0)),          # b_out
            ],
            out_specs=pl.BlockSpec((tb, OUT_p), lambda b, l: (b, 0)),
            scratch_shapes=[pltpu.VMEM((tb, H_p), jnp.float32)],        # hidden state
        ),
        compiler_params=compiler_params,
        cost_estimate=cost,
    )(x_p, kparams["w_in"], kparams["b_in"], kparams["w_dend"],
      kparams["soma"], kparams["w_out"], kparams["b_out"])

    return out_p[:B, :OUT]


def init_module_params(key, input_size, hidden_size, output_size,
                       num_hidden_layers, num_dendrites):
    """Deterministic synthetic parameters in the PyTorch module's layout."""
    ks = jax.random.split(key, 6)
    w_in = jax.random.normal(ks[0], (hidden_size, input_size), jnp.float32) * 0.05
    b_in = jax.random.normal(ks[1], (hidden_size,), jnp.float32) * 0.05
    w_dend = jax.random.normal(
        ks[2], (num_hidden_layers, hidden_size, num_dendrites, hidden_size),
        jnp.float32) * 0.1
    soma = jax.random.normal(
        ks[3], (num_hidden_layers, hidden_size, num_dendrites), jnp.float32) * 0.1
    w_out = jax.random.normal(ks[4], (output_size, hidden_size), jnp.float32) * 0.05
    b_out = jax.random.normal(ks[5], (output_size,), jnp.float32) * 0.05
    return (w_in, b_in, w_dend, soma, w_out, b_out)


def reference_forward(x, module_params):
    """Plain-JAX f32 reference mirroring the PyTorch forward semantics."""
    w_in, b_in, w_dend, soma, w_out, b_out = module_params
    B = x.shape[0]
    h = _leaky(x.reshape(B, -1).astype(jnp.float32) @ w_in.T + b_in)
    L = w_dend.shape[0]
    for l in range(L):
        dend = _leaky(jnp.einsum("bi,ndi->bnd", h, w_dend[l]))   # (B, H, D)
        neuron = _leaky(jnp.sum(dend * soma[l][None], axis=-1))  # (B, H)
        h = _leaky(neuron)
    return h @ w_out.T + b_out


if __name__ == "__main__":
    # Small shapes consistent with the module: image input flattened.
    B, C, Hs, Ws = 2, 4, 8, 8
    input_size = C * Hs * Ws          # 256
    hidden_size = 32
    output_size = 10
    num_hidden_layers = 2
    num_dendrites = 8                 # uniform dendrite_counts

    key = jax.random.PRNGKey(0)
    k_x, k_p = jax.random.split(key)
    x = jax.random.normal(k_x, (B, C, Hs, Ws), jnp.float32)
    module_params = init_module_params(k_p, input_size, hidden_size,
                                       output_size, num_hidden_layers,
                                       num_dendrites)

    kparams = prepare_kernel_params(module_params)
    out = dendritic_ann_forward(x, kparams)
    out = jax.block_until_ready(out)

    ref = reference_forward(x, module_params)
    assert out.shape == (B, output_size)
    # bf16 matmul inputs with f32 accumulation -> loosened tolerance vs f32 ref.
    assert jnp.allclose(out, ref, atol=2e-2, rtol=2e-2), "mismatch vs JAX reference"

    print("KERNEL_OK")
</pallas_src>

<mosaic_0001>
module attributes {stable_mosaic.version = 11 : i64} {
  func.func @dendritic_ann_kernel(%arg0: i32, %arg1: i32, %arg2: memref<8x256xbf16, #tpu.memory_space<vmem>>, %arg3: memref<256x128xbf16, #tpu.memory_space<vmem>>, %arg4: memref<1x128xf32, #tpu.memory_space<vmem>>, %arg5: memref<1x128x1024xbf16, #tpu.memory_space<vmem>>, %arg6: memref<1x8x128xf32, #tpu.memory_space<vmem>>, %arg7: memref<128x128xbf16, #tpu.memory_space<vmem>>, %arg8: memref<1x128xf32, #tpu.memory_space<vmem>>, %arg9: memref<8x128xf32, #tpu.memory_space<vmem>>, %arg10: memref<8x128xf32, #tpu.memory_space<vmem>>) attributes {dimension_semantics = [#tpu.dimension_semantics<parallel>, #tpu.dimension_semantics<arbitrary>], iteration_bounds = array<i64: 1, 2>, scalar_prefetch = 0 : i64, scratch_operands = 1 : i64, tpu.core_type = #tpu.core_type<tc>, window_params = [{transform_indices = @transform_0, window_bounds = array<i64: 8, 256>}, {pipeline_mode = #tpu.pipeline_mode<synchronous>, transform_indices = @transform_1, window_bounds = array<i64: 256, 128>}, {pipeline_mode = #tpu.pipeline_mode<synchronous>, transform_indices = @transform_2, window_bounds = array<i64: 1, 128>}, {transform_indices = @transform_3, window_bounds = array<i64: 1, 128, 1024>}, {transform_indices = @transform_4, window_bounds = array<i64: 1, 8, 128>}, {pipeline_mode = #tpu.pipeline_mode<synchronous>, transform_indices = @transform_5, window_bounds = array<i64: 128, 128>}, {pipeline_mode = #tpu.pipeline_mode<synchronous>, transform_indices = @transform_6, window_bounds = array<i64: 1, 128>}, {transform_indices = @transform_7, window_bounds = array<i64: 8, 128>}]} {
    %c0_i32 = arith.constant 0 : i32
    %0 = arith.cmpi eq, %arg1, %c0_i32 : i32
    %1 = arith.extui %0 : i1 to i32
    %c0_i32_0 = arith.constant 0 : i32
    %2 = arith.cmpi ne, %1, %c0_i32_0 : i32
    scf.if %2 {
      %c0_15 = arith.constant 0 : index
      %c0_16 = arith.constant 0 : index
      %63 = vector.load %arg2[%c0_15, %c0_16] : memref<8x256xbf16, #tpu.memory_space<vmem>>, vector<8x256xbf16>
      %c0_17 = arith.constant 0 : index
      %c0_18 = arith.constant 0 : index
      %64 = vector.load %arg3[%c0_17, %c0_18] : memref<256x128xbf16, #tpu.memory_space<vmem>>, vector<256x128xbf16>
      %cst_19 = arith.constant dense<0.000000e+00> : vector<8x128xf32>
      %65 = tpu.matmul %63, %64, %cst_19 {dimension_numbers = #tpu.dot_dimension_numbers<[1], [0], [0], [1], [0, 0, 1, 1], [], []>} : vector<8x256xbf16>, vector<256x128xbf16>, vector<8x128xf32> -> vector<8x128xf32>
      %c0_20 = arith.constant 0 : index
      %c0_21 = arith.constant 0 : index
      %66 = vector.load %arg4[%c0_20, %c0_21] : memref<1x128xf32, #tpu.memory_space<vmem>>, vector<1x128xf32>
      %67 = vector.broadcast %66 : vector<1x128xf32> to vector<8x128xf32>
      %68 = arith.addf %65, %67 : vector<8x128xf32>
      %cst_22 = arith.constant 0.000000e+00 : f32
      %69 = vector.broadcast %cst_22 : f32 to vector<8x128xf32>
      %70 = arith.cmpf oge, %68, %69 : vector<8x128xf32>
      %cst_23 = arith.constant 0.00999999977 : f32
      %71 = vector.broadcast %cst_23 : f32 to vector<8x128xf32>
      %72 = arith.mulf %71, %68 : vector<8x128xf32>
      %73 = arith.select %70, %68, %72 : vector<8x128xi1>, vector<8x128xf32>
      %c0_24 = arith.constant 0 : index
      %c0_25 = arith.constant 0 : index
      %74 = vector.load %arg10[%c0_24, %c0_25] : memref<8x128xf32, #tpu.memory_space<vmem>>, vector<8x128xf32>
      tpu.vector_store %arg10[%c0_24, %c0_25], %73 {strides = array<i32>} : memref<8x128xf32, #tpu.memory_space<vmem>>, vector<8x128xf32>,
    } else {
    }
    %c0 = arith.constant 0 : index
    %c0_1 = arith.constant 0 : index
    %3 = vector.load %arg10[%c0, %c0_1] : memref<8x128xf32, #tpu.memory_space<vmem>>, vector<8x128xf32>
    %4 = arith.truncf %3 : vector<8x128xf32> to vector<8x128xbf16>
    %c0_2 = arith.constant 0 : index
    %c0_3 = arith.constant 0 : index
    %c0_4 = arith.constant 0 : index
    %5 = vector.load %arg5[%c0_2, %c0_3, %c0_4] : memref<1x128x1024xbf16, #tpu.memory_space<vmem>>, vector<1x128x1024xbf16>
    %6 = vector.shape_cast %5 : vector<1x128x1024xbf16> to vector<128x1024xbf16>
    %cst = arith.constant dense<0.000000e+00> : vector<8x1024xf32>
    %7 = tpu.matmul %4, %6, %cst {dimension_numbers = #tpu.dot_dimension_numbers<[1], [0], [0], [1], [0, 0, 1, 1], [], []>} : vector<8x128xbf16>, vector<128x1024xbf16>, vector<8x1024xf32> -> vector<8x1024xf32>
    %cst_5 = arith.constant 0.000000e+00 : f32
    %8 = vector.broadcast %cst_5 : f32 to vector<8x1024xf32>
    %9 = arith.cmpf oge, %7, %8 : vector<8x1024xf32>
    %cst_6 = arith.constant 0.00999999977 : f32
    %10 = vector.broadcast %cst_6 : f32 to vector<8x1024xf32>
    %11 = arith.mulf %10, %7 : vector<8x1024xf32>
    %12 = arith.select %9, %7, %11 : vector<8x1024xi1>, vector<8x1024xf32>
    %c0_7 = arith.constant 0 : index
    %c0_8 = arith.constant 0 : index
    %c0_9 = arith.constant 0 : index
    %13 = vector.load %arg6[%c0_7, %c0_8, %c0_9] : memref<1x8x128xf32, #tpu.memory_space<vmem>>, vector<1x8x128xf32>
    %14 = vector.shape_cast %13 : vector<1x8x128xf32> to vector<8x128xf32>
    %15 = vector.extract_strided_slice %12 {offsets = [0, 0], sizes = [8, 128], strides = [1, 1]} : vector<8x1024xf32> to vector<8x128xf32>
    %16 = vector.extract_strided_slice %14 {offsets = [0, 0], sizes = [1, 128], strides = [1, 1]} : vector<8x128xf32> to vector<1x128xf32>
    %17 = vector.broadcast %16 : vector<1x128xf32> to vector<8x128xf32>
    %18 = arith.mulf %15, %17 : vector<8x128xf32>
    %19 = vector.extract_strided_slice %12 {offsets = [0, 128], sizes = [8, 128], strides = [1, 1]} : vector<8x1024xf32> to vector<8x128xf32>
    %20 = vector.extract_strided_slice %14 {offsets = [1, 0], sizes = [1, 128], strides = [1, 1]} : vector<8x128xf32> to vector<1x128xf32>
    %21 = vector.broadcast %20 : vector<1x128xf32> to vector<8x128xf32>
    %22 = arith.mulf %19, %21 : vector<8x128xf32>
    %23 = arith.addf %18, %22 : vector<8x128xf32>
    %24 = vector.extract_strided_slice %12 {offsets = [0, 256], sizes = [8, 128], strides = [1, 1]} : vector<8x1024xf32> to vector<8x128xf32>
    %25 = vector.extract_strided_slice %14 {offsets = [2, 0], sizes = [1, 128], strides = [1, 1]} : vector<8x128xf32> to vector<1x128xf32>
    %26 = vector.broadcast %25 : vector<1x128xf32> to vector<8x128xf32>
    %27 = arith.mulf %24, %26 : vector<8x128xf32>
    %28 = arith.addf %23, %27 : vector<8x128xf32>
    %29 = vector.extract_strided_slice %12 {offsets = [0, 384], sizes = [8, 128], strides = [1, 1]} : vector<8x1024xf32> to vector<8x128xf32>
    %30 = vector.extract_strided_slice %14 {offsets = [3, 0], sizes = [1, 128], strides = [1, 1]} : vector<8x128xf32> to vector<1x128xf32>
    %31 = vector.broadcast %30 : vector<1x128xf32> to vector<8x128xf32>
    %32 = arith.mulf %29, %31 : vector<8x128xf32>
    %33 = arith.addf %28, %32 : vector<8x128xf32>
    %34 = vector.extract_strided_slice %12 {offsets = [0, 512], sizes = [8, 128], strides = [1, 1]} : vector<8x1024xf32> to vector<8x128xf32>
    %35 = vector.extract_strided_slice %14 {offsets = [4, 0], sizes = [1, 128], strides = [1, 1]} : vector<8x128xf32> to vector<1x128xf32>
    %36 = vector.broadcast %35 : vector<1x128xf32> to vector<8x128xf32>
    %37 = arith.mulf %34, %36 : vector<8x128xf32>
    %38 = arith.addf %33, %37 : vector<8x128xf32>
    %39 = vector.extract_strided_slice %12 {offsets = [0, 640], sizes = [8, 128], strides = [1, 1]} : vector<8x1024xf32> to vector<8x128xf32>
    %40 = vector.extract_strided_slice %14 {offsets = [5, 0], sizes = [1, 128], strides = [1, 1]} : vector<8x128xf32> to vector<1x128xf32>
    %41 = vector.broadcast %40 : vector<1x128xf32> to vector<8x128xf32>
    %42 = arith.mulf %39, %41 : vector<8x128xf32>
    %43 = arith.addf %38, %42 : vector<8x128xf32>
    %44 = vector.extract_strided_slice %12 {offsets = [0, 768], sizes = [8, 128], strides = [1, 1]} : vector<8x1024xf32> to vector<8x128xf32>
    %45 = vector.extract_strided_slice %14 {offsets = [6, 0], sizes = [1, 128], strides = [1, 1]} : vector<8x128xf32> to vector<1x128xf32>
    %46 = vector.broadcast %45 : vector<1x128xf32> to vector<8x128xf32>
    %47 = arith.mulf %44, %46 : vector<8x128xf32>
    %48 = arith.addf %43, %47 : vector<8x128xf32>
    %49 = vector.extract_strided_slice %12 {offsets = [0, 896], sizes = [8, 128], strides = [1, 1]} : vector<8x1024xf32> to vector<8x128xf32>
    %50 = vector.extract_strided_slice %14 {offsets = [7, 0], sizes = [1, 128], strides = [1, 1]} : vector<8x128xf32> to vector<1x128xf32>
    %51 = vector.broadcast %50 : vector<1x128xf32> to vector<8x128xf32>
    %52 = arith.mulf %49, %51 : vector<8x128xf32>
    %53 = arith.addf %48, %52 : vector<8x128xf32>
    %cst_10 = arith.constant 0.000000e+00 : f32
    %54 = vector.broadcast %cst_10 : f32 to vector<8x128xf32>
    %55 = arith.cmpf oge, %53, %54 : vector<8x128xf32>
    %cst_11 = arith.constant 9.99999974E-5 : f32
    %56 = vector.broadcast %cst_11 : f32 to vector<8x128xf32>
    %57 = arith.mulf %56, %53 : vector<8x128xf32>
    %58 = arith.select %55, %53, %57 : vector<8x128xi1>, vector<8x128xf32>
    %c0_12 = arith.constant 0 : index
    %c0_13 = arith.constant 0 : index
    %59 = vector.load %arg10[%c0_12, %c0_13] : memref<8x128xf32, #tpu.memory_space<vmem>>, vector<8x128xf32>
    tpu.vector_store %arg10[%c0_12, %c0_13], %58 {strides = array<i32>} : memref<8x128xf32, #tpu.memory_space<vmem>>, vector<8x128xf32>,
    %c1_i32 = arith.constant 1 : i32
    %60 = arith.cmpi eq, %arg1, %c1_i32 : i32
    %61 = arith.extui %60 : i1 to i32
    %c0_i32_14 = arith.constant 0 : i32
    %62 = arith.cmpi ne, %61, %c0_i32_14 : i32
    scf.if %62 {
      %c0_15 = arith.constant 0 : index
      %c0_16 = arith.constant 0 : index
      %63 = vector.load %arg10[%c0_15, %c0_16] : memref<8x128xf32, #tpu.memory_space<vmem>>, vector<8x128xf32>
      %64 = arith.truncf %63 : vector<8x128xf32> to vector<8x128xbf16>
      %c0_17 = arith.constant 0 : index
      %c0_18 = arith.constant 0 : index
      %65 = vector.load %arg7[%c0_17, %c0_18] : memref<128x128xbf16, #tpu.memory_space<vmem>>, vector<128x128xbf16>
      %cst_19 = arith.constant dense<0.000000e+00> : vector<8x128xf32>
      %66 = tpu.matmul %64, %65, %cst_19 {dimension_numbers = #tpu.dot_dimension_numbers<[1], [0], [0], [1], [0, 0, 1, 1], [], []>} : vector<8x128xbf16>, vector<128x128xbf16>, vector<8x128xf32> -> vector<8x128xf32>
      %c0_20 = arith.constant 0 : index
      %c0_21 = arith.constant 0 : index
      %67 = vector.load %arg8[%c0_20, %c0_21] : memref<1x128xf32, #tpu.memory_space<vmem>>, vector<1x128xf32>
      %68 = vector.broadcast %67 : vector<1x128xf32> to vector<8x128xf32>
      %69 = arith.addf %66, %68 : vector<8x128xf32>
      %c0_22 = arith.constant 0 : index
      %c0_23 = arith.constant 0 : index
      %70 = vector.load %arg9[%c0_22, %c0_23] : memref<8x128xf32, #tpu.memory_space<vmem>>, vector<8x128xf32>
      tpu.vector_store %arg9[%c0_22, %c0_23], %69 {strides = array<i32>} : memref<8x128xf32, #tpu.memory_space<vmem>>, vector<8x128xf32>,
    } else {
    }
    return
  }
  func.func @transform_0(%arg0: i32, %arg1: i32) -> (i32, i32) {
    %c0_i32 = arith.constant 0 : i32
    %c0_i32_0 = arith.constant 0 : i32
    return %arg0, %c0_i32 : i32, i32
  }
  func.func @transform_1(%arg0: i32, %arg1: i32) -> (i32, i32) {
    %c0_i32 = arith.constant 0 : i32
    %c0_i32_0 = arith.constant 0 : i32
    %c0_i32_1 = arith.constant 0 : i32
    return %c0_i32, %c0_i32_0 : i32, i32
  }
  func.func @transform_2(%arg0: i32, %arg1: i32) -> (i32, i32) {
    %c0_i32 = arith.constant 0 : i32
    %c0_i32_0 = arith.constant 0 : i32
    %c0_i32_1 = arith.constant 0 : i32
    return %c0_i32, %c0_i32_0 : i32, i32
  }
  func.func @transform_3(%arg0: i32, %arg1: i32) -> (i32, i32, i32) {
    %c0_i32 = arith.constant 0 : i32
    %c0_i32_0 = arith.constant 0 : i32
    %c0_i32_1 = arith.constant 0 : i32
    return %arg1, %c0_i32, %c0_i32_0 : i32, i32, i32
  }
  func.func @transform_4(%arg0: i32, %arg1: i32) -> (i32, i32, i32) {
    %c0_i32 = arith.constant 0 : i32
    %c0_i32_0 = arith.constant 0 : i32
    %c0_i32_1 = arith.constant 0 : i32
    return %arg1, %c0_i32, %c0_i32_0 : i32, i32, i32
  }
  func.func @transform_5(%arg0: i32, %arg1: i32) -> (i32, i32) {
    %c0_i32 = arith.constant 0 : i32
    %c0_i32_0 = arith.constant 0 : i32
    %c0_i32_1 = arith.constant 0 : i32
    return %c0_i32, %c0_i32_0 : i32, i32
  }
  func.func @transform_6(%arg0: i32, %arg1: i32) -> (i32, i32) {
    %c0_i32 = arith.constant 0 : i32
    %c0_i32_0 = arith.constant 0 : i32
    %c0_i32_1 = arith.constant 0 : i32
    return %c0_i32, %c0_i32_0 : i32, i32
  }
  func.func @transform_7(%arg0: i32, %arg1: i32) -> (i32, i32) {
    %c0_i32 = arith.constant 0 : i32
    %c0_i32_0 = arith.constant 0 : i32
    return %arg0, %c0_i32 : i32, i32
  }
}

</mosaic_0001>

<bundles_post_ra>
// kernel: tpu_custom_call.1
= control target key start
LH: loop header
LB: loop body
LE: loop exit
PB: predicated region body
PF: predicated region fallthrough
CT: control target
= control target key end

     0   :  { %s2404_s0 = inlined_call_operand.hbm [shape: bf16[8,256], index: 0, kind: input, shape index: {}]   ;;  %s2405_s1 = inlined_call_operand.hbm [shape: bf16[256,128], index: 1, kind: input, shape index: {}]   ;;  %s2406_s2 = inlined_call_operand.vmem [shape: f32[1,128], index: 2, kind: input, shape index: {}]   ;;  %s2407_s3 = inlined_call_operand.hbm [shape: bf16[2,128,1024], index: 3, kind: input, shape index: {}]   ;;  %s2408_s4 = inlined_call_operand.hbm [shape: f32[2,8,128], index: 4, kind: input, shape index: {}]   ;;  %s2409_s5 = inlined_call_operand.hbm [shape: bf16[128,128], index: 5, kind: input, shape index: {}]   ;;  %s2410_s6 = inlined_call_operand.vmem [shape: f32[1,128], index: 6, kind: input, shape index: {}]   ;;  %s2411_s7 = inlined_call_operand.hbm [shape: f32[8,128], index: 7, kind: output, shape index: {}]  }
   0x1   :  { %2424 = sst [smem:[#allocation20_spill]] %s2404_s0 }
   0x2   :  { %2425 = sst [smem:[#allocation21_spill]] %s2405_s1 }
   0x3   :  { %2426 = sst [smem:[#allocation22_spill]] %s2407_s3 }
   0x4   :  { %2427 = sst [smem:[#allocation23_spill]] %s2411_s7 }
   0x5   :  { %12 = vsyncpa [#allocation4], 0 }
   0x6   :  { %13 = vsyncpa [#allocation7], 0 }
   0x7   :  { %14 = vsyncpa [#allocation5], 0  ;;  %s2028_s24 = smov 0   ;;  %s2030_s25 = smov 0  }
   0x8   :  { %s2032_s26 = smov 0   ;;  %s2034_s27 = smov 0  }
   0x9   :  { %s2036_s28 = smov 0   ;;  %s2038_s29 = smov 0  }
   0xa LB: > { %2428 = sst [smem:[#allocation17_spill]] %s1973_s29  ;;  %s2057_s30 = sadd.s32 4294967295, %s1973_s29   ;;  %s1973_s29 = sphi %s2038_s29, %s20_s29   ;;  %s1969_s28 = sphi %s2036_s28, %s2463_s28   ;;  %s1965_s27 = sphi %s2034_s27, %s2462_s27   ;;  %s1961_s26 = sphi %s2032_s26, %s2461_s26   ;;  %s1957_s25 = sphi %s2030_s25, %s2460_s25   ;;  %s1953_s24 = sphi %s2028_s24, %s2459_s24  }
   0xb   : > { %p114_p0 = scmp.ne.s32.totalorder %s1961_s26, %s1957_s25  ;;  %p115_p1 = scmp.eq.s32.totalorder %s1973_s29, 0 }
   0xc   : > { %p120_p2 = scmp.ne.s32.totalorder %s1957_s25, %s1953_s24  ;;  %p2412_p3 = scmp.eq.s32.totalorder %s2057_s30, 0 }
   0xd   : > { %p116_p4 = por %p115_p1, %p114_p0  ;;  %p1440_p5 = scmp.ge.s32.totalorder %s1973_s29, 1 }
   0xe   : > { %p2068_p6 = por %p2412_p3, %p120_p2  ;;  %p225_p7 = scmp.lt.s32.totalorder %s1973_s29, 3 }
   0xf   : > { %s1975_s11 = smov [#allocation3]   ;;  %p1646_p10 = scmp.lt.s32.totalorder %s1973_s29, 2 }
  0x10   : > { %s2429_s9 = scalar_select %p2068_p6, 1, 0 }
  0x11   : > { %p2073_p8 = pnand %p1440_p5, %p225_p7  ;;  %s241_s12 = sshll.u32 %s1975_s11, 4  ;;  %s242_s12 = int_to_ptr.vmem [resolvable:$true] %s241_s12 }
  0x12   : > { %p2086_p12 = pnand %p1646_p10, %p116_p4  ;;  %s1976_s15 = smov [#allocation6]  }
  0x13   : > { %s2430_s10 = scalar_select %p2073_p8, 1, 0 }
  0x14   : > { %p1626_p9 = pneg %p2073_p8  ;;  %s251_s16 = sshll.u32 %s1976_s15, 4  ;;  %s252_s16 = int_to_ptr.vmem [resolvable:$true] %s251_s16 }
  0x15   : > { %s2432_s14 = scalar_select %p2086_p12, 1, 0 }
  0x16   : > { %p2082_p11 = pnand %p1626_p9, %p2412_p3  ;;  %s2433_s0 = sld [smem:[#allocation20_spill]] }
  0x18   : > { %s2431_s13 = scalar_select %p2082_p11, 1, 0 }
  0x19   : > { %p2098_p0 = pneg %p2082_p11 }
  0x1c   : > { %s1737_s19 = scalar_lea.hbm %s2433_s0, 128 }
  0x1d   : > { %p1738_p13 = scmp.ne.s32.totalorder %s2433_s0, %s1737_s19  ;;  %p1744_p4 = scmp.lt.u32.totalorder %s1737_s19, %s2433_s0 }
  0x1f   : > { %p1740_p1 = pnand %p2098_p0, %p1738_p13 }
  0x21   : > { %p1741_p2 = pneg %p1740_p1 }
  0x23   : > { %p1746_p5 = pnand %p1744_p4, %p1741_p2 }
  0x25   : > { %1749 = shalt.err (!%p1746_p5)
}
  0x26   : > { %s1750_s11 = scalar_lea.vmem %s242_s12, 128  ;;  %p1758_p3 = scmp.lt.s32.totalorder %s242_s12, %s242_s12 }
  0x27   : > { %p1751_p7 = scmp.ne.s32.totalorder %s242_s12, %s1750_s11  ;;  %p1759_p6 = scmp.lt.s32.totalorder %s1750_s11, %s1750_s11 }
  0x29   : > { %p1753_p9 = pnand %p1751_p7, %p2098_p0  ;;  %p1760_p8 = por %p1759_p6, %p1758_p3 }
  0x2b   : > { %p1754_p10 = pneg %p1753_p9 }
  0x2d   : > { %p1761_p12 = pnand %p1760_p8, %p1754_p10 }
  0x2f   : > { %1764 = shalt.err (!%p1761_p12)
}
  0x30   : > { %1629 = dma.hbm_to_vmem [thread:$0]  (!%p2082_p11), %s2433_s0, 128, %s242_s12, [#allocation4]  }
  0x31   : > { %s2435_s1 = sld [smem:[#allocation21_spill]] }
  0x37   : > { %s1765_s20 = scalar_lea.hbm %s2435_s1, 2048 }
  0x38   : > { %p1766_p13 = scmp.ne.s32.totalorder %s2435_s1, %s1765_s20  ;;  %p1772_p8 = scmp.lt.u32.totalorder %s1765_s20, %s2435_s1 }
  0x3a   : > { %p1768_p3 = pnand %p1766_p13, %p2098_p0 }
  0x3c   : > { %p1769_p6 = pneg %p1768_p3 }
  0x3e   : > { %p1774_p12 = pnand %p1772_p8, %p1769_p6 }
  0x40   : > { %1777 = shalt.err (!%p1774_p12)
}
  0x41   : > { %s1778_s15 = scalar_lea.vmem %s252_s16, 2048  ;;  %p1786_p5 = scmp.lt.s32.totalorder %s252_s16, %s252_s16 }
  0x42   : > { %p1779_p1 = scmp.ne.s32.totalorder %s252_s16, %s1778_s15  ;;  %p1787_p7 = scmp.lt.s32.totalorder %s1778_s15, %s1778_s15 }
  0x44   : > { %p1781_p2 = pnand %p1779_p1, %p2098_p0  ;;  %p1788_p9 = por %p1787_p7, %p1786_p5 }
  0x46   : > { %p1782_p4 = pneg %p1781_p2 }
  0x48   : > { %p1789_p10 = pnand %p1788_p9, %p1782_p4 }
  0x4a   : > { %1792 = shalt.err (!%p1789_p10)
}
  0x4b   : > { %s2416_s12 = smov 64   ;;  %s2417_s17 = smov 4  }
  0x4c   : > { %1632 = dma.hbm_to_vmem [thread:$0]  (!%p2082_p11), %s2435_s1, 2048, %s252_s16, [#allocation7], %s2416_s12, %s2416_s12, %s2417_s17  }
  0x4d   : > { %s284_s20 = sand.u32 1, %s1973_s29   ;;  %s29_s21 = sadd.s32 1, %s1969_s28 }
  0x4e   : > { %p30_p13 = scmp.ge.s32.totalorder %s29_s21, 2  ;;  %s2418_s23 = sand.u32 1, %s1961_s26  }
  0x4f   : > { %s1445_s24 = sshll.u32 %s2418_s23, 9  ;;  %s1554_s11 = sshll.u32 %s1969_s28, 13 }
  0x50   : > { %s2465_s21 = smov (%p30_p13, %s29_s21), 0  ;;  %s2437_s3 = sld [smem:[#allocation22_spill]] }
  0x51   : > { %2436 = sst [smem:[#allocation18_spill]] %s2465_s21  ;;  %s104_s16 = ssub.s32 %s1969_s28, %s2465_s21 }
  0x52   : > { %s288_s18 = scalar_lea.vmem [#allocation8], %s1445_s24  ;;  %p105_p3 = scmp.eq.s32.totalorder %s104_s16, 0 }
  0x53   : > { %s295_s19 = sshll.u32 %s288_s18, 4  ;;  %s2438_s12 = sadd.s32 1, %s1961_s26  ;;  %s2150_s19 = int_to_ptr.vmem [resolvable:$true] %s295_s19 }
  0x54   : > { %s2155_s17 = scalar_select %p105_p3, %s1961_s26, %s2438_s12  }
  0x55   : > { %s2157_s23 = scalar_lea.sflag [#allocation4], %s284_s20  ;;  %p2440_p8 = scmp.ne.s32.totalorder %s2432_s14, 0 }
  0x56   : > { %s2146_s0 = scalar_lea.hbm %s2437_s3, %s1554_s11  ;;  %2439 = sst [smem:[#allocation19_spill]] %s2155_s17 }
  0x57   : > { %s1793_s1 = scalar_lea.hbm %s2146_s0, 8192  ;;  %p2423_p12 = pneg %p2440_p8 }
  0x58   : > { %p1794_p6 = scmp.ne.s32.totalorder %s2146_s0, %s1793_s1  ;;  %s1798_s24 = scalar_lea.hbm %s2437_s3, 16384 }
  0x59   : > { %p1799_p4 = scmp.lt.u32.totalorder %s2146_s0, %s2437_s3  ;;  %p1800_p5 = scmp.lt.u32.totalorder %s1798_s24, %s1793_s1 }
  0x5a   : > { %p1796_p1 = pnand %p2423_p12, %p1794_p6  ;;  %p1802_p9 = scmp.lt.u32.totalorder %s1793_s1, %s2146_s0 }
  0x5b   : > { %p1801_p7 = por %p1800_p5, %p1799_p4 }
  0x5c   : > { %p1797_p2 = pneg %p1796_p1 }
  0x5d   : > { %p1803_p10 = por %p1802_p9, %p1801_p7 }
  0x5f   : > { %p1804_p13 = pnand %p1803_p10, %p1797_p2 }
  0x61   : > { %1807 = shalt.err (!%p1804_p13)
}
  0x62   : > { %s1808_s12 = scalar_lea.vmem %s2150_s19, 8192  ;;  %s1979_s20 = smov [#allocation8]  }
  0x63   : > { %p1809_p3 = scmp.ne.s32.totalorder %s2150_s19, %s1808_s12  ;;  %s1813_s18 = sshll.u32 %s1979_s20, 4  ;;  %s1814_s18 = int_to_ptr.vmem [resolvable:$false] %s1813_s18 }
  0x64   : > { %s1815_s8 = scalar_lea.vmem %s1814_s18, 16384  ;;  %p1816_p11 = scmp.lt.s32.totalorder %s2150_s19, %s1814_s18 }
  0x65   : > { %p1811_p6 = pnand %p1809_p3, %p2423_p12  ;;  %p1817_p4 = scmp.lt.s32.totalorder %s1815_s8, %s1808_s12 }
  0x67   : > { %p1812_p1 = pneg %p1811_p6  ;;  %p1818_p5 = por %p1817_p4, %p1816_p11 }
  0x69   : > { %p1819_p7 = pnand %p1818_p5, %p1812_p1 }
  0x6b   : > { %1822 = shalt.err (!%p1819_p7)
}
  0x6c   : > { %s1980_s1 = smov 512   ;;  %s1981_s11 = smov 32  }
  0x6d   : > { %1639 = dma.hbm_to_vmem [thread:$0]  (!%p2440_p8), %s2146_s0, 8192, %s2150_s19, %s2157_s23, %s1980_s1, %s1980_s1, %s1981_s11  }
  0x6e   : > { %s2441_s24 = sand.u32 1, %s1961_s26   ;;  %s1982_s16 = smov [#allocation10]  }
  0x6f   : > { %s1448_s15 = sshll.u32 %s2441_s24, 3  ;;  %s267_s20 = sshll.u32 %s1982_s16, 4  ;;  %s268_s20 = int_to_ptr.vmem [resolvable:$true] %s267_s20 }
  0x70   : > { %s1449_s12 = sshll.u32 %s1969_s28, 7  ;;  %s1823_s3 = scalar_lea.hbm %s2409_s5, 1024 }
  0x71   : > { %p1824_p11 = scmp.ne.s32.totalorder %s2409_s5, %s1823_s3  ;;  %p1830_p10 = scmp.lt.u32.totalorder %s1823_s3, %s2409_s5 }
  0x73   : > { %p1826_p2 = pnand %p1824_p11, %p2098_p0 }
  0x75   : > { %p1827_p9 = pneg %p1826_p2 }
  0x77   : > { %p1832_p13 = pnand %p1830_p10, %p1827_p9 }
  0x79   : > { %1835 = shalt.err (!%p1832_p13)
}
  0x7a   : > { %s1836_s0 = scalar_lea.vmem %s268_s20, 1024  ;;  %p1844_p4 = scmp.lt.s32.totalorder %s268_s20, %s268_s20 }
  0x7b   : > { %p1837_p3 = scmp.ne.s32.totalorder %s268_s20, %s1836_s0  ;;  %p1845_p5 = scmp.lt.s32.totalorder %s1836_s0, %s1836_s0 }
  0x7d   : > { %p1839_p6 = pnand %p1837_p3, %p2098_p0  ;;  %p1846_p7 = por %p1845_p5, %p1844_p4 }
  0x7f   : > { %p1840_p1 = pneg %p1839_p6 }
  0x81   : > { %p1847_p12 = pnand %p1846_p7, %p1840_p1 }
  0x83   : > { %1850 = shalt.err (!%p1847_p12)
}
  0x84   : > { %p2442_p11 = scmp.ne.s32.totalorder %s2431_s13, 0  ;;  %s2443_s17 = smov 4  }
  0x85   : > { %s2444_s21 = smov 64   ;;  %s2212_s22 = scalar_lea.hbm %s2408_s4, %s1449_s12 }
  0x86   : > { %1635 = dma.hbm_to_vmem [thread:$0]  (!%p2442_p11), %s2409_s5, 1024, %s268_s20, [#allocation7], %s2444_s21, %s2444_s21, %s2443_s17  }
  0x87   : > { %s309_s1 = scalar_lea.vmem [#allocation9], %s1448_s15  ;;  %s1851_s13 = scalar_lea.hbm %s2212_s22, 128 }
  0x88   : > { %s316_s11 = sshll.u32 %s309_s1, 4  ;;  %p1852_p0 = scmp.ne.s32.totalorder %s2212_s22, %s1851_s13  ;;  %s317_s11 = int_to_ptr.vmem [resolvable:$true] %s316_s11 }
  0x89   : > { %p2445_p12 = pneg %p2440_p8  ;;  %s1856_s20 = scalar_lea.hbm %s2408_s4, 256 }
  0x8a   : > { %p1857_p10 = scmp.lt.u32.totalorder %s2212_s22, %s2408_s4  ;;  %p1858_p13 = scmp.lt.u32.totalorder %s1856_s20, %s1851_s13 }
  0x8b   : > { %p1854_p2 = pnand %p1852_p0, %p2445_p12  ;;  %p1860_p6 = scmp.lt.u32.totalorder %s1851_s13, %s2212_s22 }
  0x8c   : > { %p1859_p3 = por %p1858_p13, %p1857_p10 }
  0x8d   : > { %p1855_p9 = pneg %p1854_p2 }
  0x8e   : > { %p1861_p1 = por %p1860_p6, %p1859_p3 }
  0x90   : > { %p1862_p4 = pnand %p1861_p1, %p1855_p9 }
  0x92   : > { %1865 = shalt.err (!%p1862_p4)
}
  0x93   : > { %s1866_s15 = scalar_lea.vmem %s317_s11, 128  ;;  %p2446_p7 = pmov %p2445_p12 }
  0x94   : > { %p1867_p5 = scmp.ne.s32.totalorder %s317_s11, %s1866_s15  ;;  %s1983_s8 = smov [#allocation9]  }
  0x95   : > { %s1871_s0 = sshll.u32 %s1983_s8, 4  ;;  %s1872_s0 = int_to_ptr.vmem [resolvable:$false] %s1871_s0 }
  0x96   : > { %p1869_p11 = pnand %p1867_p5, %p2446_p7  ;;  %s1873_s17 = scalar_lea.vmem %s1872_s0, 256 }
  0x97   : > { %p1874_p12 = scmp.lt.s32.totalorder %s317_s11, %s1872_s0  ;;  %p1875_p2 = scmp.lt.s32.totalorder %s1873_s17, %s1866_s15 }
  0x98   : > { %p1870_p0 = pneg %p1869_p11 }
  0x99   : > { %p1876_p10 = por %p1875_p2, %p1874_p12 }
  0x9b   : > { %p1877_p13 = pnand %p1876_p10, %p1870_p0 }
  0x9d   : > { %1880 = shalt.err (!%p1877_p13)
}
  0x9e   : > { %1642 = dma.hbm_to_vmem [thread:$0]  (!%p2440_p8), %s2212_s22, 128, %s317_s11, %s2157_s23  }
  0x9f   : > { %p2447_p9 = scmp.ne.s32.totalorder %s2430_s10, 0 }
  0xa0   : > { %p2448_p3 = scmp.eq.s32.totalorder (!%p2447_p9), %s2057_s30, 0 }
  0xa1   : > { %325 = sbr.rel (%p2447_p9) target bundleno = 987 (0x3db), region = 48 }
  0xa8   : > { %1932 = dma.done.wait (%p2448_p3), [#allocation4], 128   ;;  %p2449_p6 = pmov %p2448_p3 }
  0xa9   : > { %p2450_p1 = pmov %p2448_p3 }
  0xaa   : > { %1934 = vsyncadd (%p2449_p6), [#allocation4], 4294967168 }
  0xab   : > { %1936 = dma.done.wait (%p2450_p1), [#allocation7], 2048   ;;  %p2451_p4 = pmov %p2450_p1 }
  0xac   : > { %s335_s14 = sand.u32 1, %s2057_s30   ;;  %s337_s23 = sand.u32 1, %s1957_s25  }
  0xad   : > { %1938 = vsyncadd (%p2451_p4), [#allocation7], 4294965248  ;;  %s1453_s21 = sshll.u32 %s337_s23, 9  ;;  %s336_s10 = scalar_lea.sflag [#allocation4], %s335_s14 }
  0xae   : > { %s2246_s7 = scalar_lea.vmem [#allocation8], %s1453_s21  ;;  %p2452_p8 = scmp.ne.s32.totalorder %s2429_s9, 0 }
  0xb0   : > { %1940 = dma.done.wait (%p2452_p8), %s336_s10, 8320  }
  0xb1   : > { %1942 = vsyncadd (%p2452_p8), %s336_s10, 4294958976  ;;  %s2252_s3 = sshll.u32 %s337_s23, 3  ;;  %p2453_p5 = pmov %p2450_p1 }
  0xb2   : > { %s348_s29 = scalar_lea.vmem [#allocation9], %s2252_s3 }
  0xb3   : > { %1944 = dma.done.wait (%p2453_p5), [#allocation7], 1024   ;;  %p2454_p7 = pmov %p2450_p1 }
  0xb4   : > { %p1456_p11 = scmp.ne.s32.totalorder %s1965_s27, 0 }
  0xb5   : > { %1946 = vsyncadd (%p2454_p7), [#allocation7], 4294966272  ;;  %v1711_v0 = vld [vmem:[#allocation6 + $0x40] sm:$0xff] (!%p1456_p11)   ;;  %v1713_v2 = vld [vmem:[#allocation6 + $0x48] sm:$0xff] (!%p1456_p11)  }
  0xb6   : > { %387 = sbr.rel (%p1456_p11) target bundleno = 435 (0x1b3), region = 72  ;;  %v1712_v1 = vld [vmem:[#allocation6] sm:$0xff] (!%p1456_p11)   ;;  %1555 = vmatprep.subr.bf16.mxu0 (!%p1456_p11), %v1711_v0  ;;  %v1714_v3 = vld [vmem:[#allocation6 + $0x8] sm:$0xff] (!%p1456_p11)   ;;  %v1715_v4 = vld [vmem:[#allocation6 + $0x50] sm:$0xff] (!%p1456_p11)  }
  0xb7   : > { %1556 = vmatpush3.bf16.msra.mxu0 (!%p1456_p11), %v1712_v1  ;;  %v1716_v5 = vld [vmem:[#allocation6 + $0x10] sm:$0xff] (!%p1456_p11)   ;;  %v1717_v6 = vld [vmem:[#allocation6 + $0x58] sm:$0xff] (!%p1456_p11)   ;;  %v1719_v8 = vld [vmem:[#allocation6 + $0x60] sm:$0xff] (!%p1456_p11)  }
  0xb8   : > { %1557 = vmatprep.subr.bf16.mxu0 (!%p1456_p11), %v1713_v2  ;;  %v1718_v7 = vld [vmem:[#allocation6 + $0x18] sm:$0xff] (!%p1456_p11)   ;;  %v1720_v9 = vld [vmem:[#allocation6 + $0x20] sm:$0xff] (!%p1456_p11)   ;;  %v1721_v10 = vld [vmem:[#allocation6 + $0x68] sm:$0xff] (!%p1456_p11)  }
  0xb9   : > { %v388_v11 = vld [vmem:[#allocation3] sm:$0xff] (!%p1456_p11)  ;;  %v1722_v13 = vld [vmem:[#allocation6 + $0x28] sm:$0xff] (!%p1456_p11)   ;;  %v1723_v14 = vld [vmem:[#allocation6 + $0x70] sm:$0xff] (!%p1456_p11)  }
  0xba   : > { %v1459_v12 = vcombine.high (!%p1456_p11), %v388_v11, %v388_v11  ;;  %v1724_v15 = vld [vmem:[#allocation6 + $0x30] sm:$0xff] (!%p1456_p11)   ;;  %v1725_v16 = vld [vmem:[#allocation6 + $0x78] sm:$0xff] (!%p1456_p11)   ;;  %v1458_v18 = vcombine.low (!%p1456_p11), %v388_v11, %v388_v11 }
  0xbb   : > { %1558 = vmatpush3.bf16.msra.mxu0 (!%p1456_p11), %v1714_v3  ;;  %v1726_v17 = vld [vmem:[#allocation6 + $0x38] sm:$0xff] (!%p1456_p11)   ;;  %v1457_v20 = vld [vmem:[%s2406_s2] ss:$0 sm:$0xff] (!%p1456_p11) }
  0xbc   : > { %1559 = vmatprep.subr.bf16.mxu0 (!%p1456_p11), %v1715_v4  ;;  %563 = vmatprep.mubr.bf16.mxu0 (!%p1456_p11), %v1459_v12 }
  0xbf   : > { %1560 = vmatpush3.bf16.msra.mxu0 %v1716_v5 }
  0xc0   : > { %1561 = vmatprep.subr.bf16.mxu0 %v1717_v6 }
  0xc3   : > { %1562 = vmatpush3.bf16.msra.mxu0 %v1718_v7 }
  0xc4   : > { %1563 = vmatprep.subr.bf16.mxu0 %v1719_v8 }
  0xc7   : > { %1564 = vmatpush3.bf16.msra.mxu0 %v1720_v9 }
  0xc8   : > { %1565 = vmatprep.subr.bf16.mxu0 %v1721_v10 }
  0xcb   : > { %1566 = vmatpush3.bf16.msra.mxu0 %v1722_v13 }
  0xcc   : > { %1567 = vmatprep.subr.bf16.mxu0 %v1723_v14 }
  0xcf   : > { %1568 = vmatpush3.bf16.msra.mxu0 %v1724_v15 }
  0xd0   : > { %1569 = vmatprep.subr.bf16.mxu0 %v1725_v16 }
  0xd3   : > { %1570 = vmatpush3.bf16.msra.mxu0 %v1726_v17 }
  0xd6   : > { %564 = vmatmul.mubr.bf16.vlgmr.msra.gmra.mrb[0].mxu0 %v1458_v18 }
 0x1a9   : > { %v1571_v19 = vpop.f32.mrb[0].mxu0 }
 0x1aa   : > { %v1572_v21 = vpop.f32.mrb[1].mxu0 }
 0x1ab   : > { %v1573_v22 = vadd.f32 %v1572_v21, %v1571_v19  ;;  %v1574_v23 = vpop.f32.mrb[2].mxu0 }
 0x1ac   : > { %v1575_v24 = vpop.f32.mrb[3].mxu0 }
 0x1ad   : > { %v566_v25 = vadd.f32 %v1573_v22, %v1457_v20 }
 0x1af   : > { %vm571_vm0 = vcmp.ge.f32.partialorder %v566_v25, 0.0  ;;  %v572_v26 = vmul.f32 0.01, %v566_v25 }
 0x1b1   : > { %v573_v27 = vsel %vm571_vm0, %v566_v25, %v572_v26 }
 0x1b2   : > { %574 = vst [vmem:[#allocation2] sm:$0xff] %v573_v27 }
 0x1b3 PF: > { %v577_v28 = vld [vmem:[%s2246_s7] sm:$0xff]  ;;  %v578_v30 = vld [vmem:[%s2246_s7 + $0x8] sm:$0xff]  ;;  %v1984_v36 = vmov 0   ;;  %v579_v27 = vld [vmem:[%s2246_s7 + $0x10] sm:$0xff]  ;;  %p1540_p0 = scmp.ne.s32.totalorder %s1965_s27, 1 }
 0x1b4   : > { %v581_v29 = vld [vmem:[%s2246_s7 + $0x20] sm:$0xff]  ;;  %v582_v33 = vld [vmem:[%s2246_s7 + $0x28] sm:$0xff]  ;;  %993 = vmatprep.mubr.bf16.mxu0 %v1984_v36  ;;  %1034 = vmatprep.mubr.bf16.mxu1 %v1984_v36  ;;  %vm1986_vm10 = vmmov (!%p1540_p0), 0  }
 0x1b5   : > { %v1477_v31 = vcombine.high %v577_v28, %v581_v29  ;;  %v1476_v32 = vcombine.low %v577_v28, %v581_v29  ;;  %v585_v34 = vld [vmem:[%s2246_s7 + $0x40] sm:$0xff]  ;;  %v1479_v37 = vcombine.high %v578_v30, %v582_v33  ;;  %v1478_v38 = vcombine.low %v578_v30, %v582_v33  ;;  %v586_v40 = vld [vmem:[%s2246_s7 + $0x48] sm:$0xff]  ;;  %v583_v28 = vld [vmem:[%s2246_s7 + $0x30] sm:$0xff] }
 0x1b6   : > { %v589_v35 = vld [vmem:[%s2246_s7 + $0x60] sm:$0xff]  ;;  %v590_v41 = vld [vmem:[%s2246_s7 + $0x68] sm:$0xff]  ;;  %v580_v29 = vld [vmem:[%s2246_s7 + $0x18] sm:$0xff] }
 0x1b7   : > { %v1485_v39 = vcombine.high %v585_v34, %v589_v35  ;;  %v593_v42 = vld [vmem:[%s2246_s7 + $0x80] sm:$0xff]  ;;  %961 = vmatprep.subr.bf16.mxu0 %v1477_v31  ;;  %v1487_v43 = vcombine.high %v586_v40, %v590_v41  ;;  %v594_v45 = vld [vmem:[%s2246_s7 + $0x88] sm:$0xff]  ;;  %1002 = vmatprep.subr.bf16.mxu1 %v1479_v37  ;;  %v1484_v47 = vcombine.low %v585_v34, %v589_v35  ;;  %v584_v30 = vld [vmem:[%s2246_s7 + $0x38] sm:$0xff] }
 0x1b8   : > { %v597_v44 = vld [vmem:[%s2246_s7 + $0xa0] sm:$0xff]  ;;  %v598_v46 = vld [vmem:[%s2246_s7 + $0xa8] sm:$0xff]  ;;  %962 = vmatpush1.bf16.msra.mxu0 %v1476_v32  ;;  %1003 = vmatpush1.bf16.msra.mxu1 %v1478_v38  ;;  %v1486_v48 = vcombine.low %v586_v40, %v590_v41  ;;  %v1481_v34 = vcombine.high %v579_v27, %v583_v28  ;;  %v1483_v35 = vcombine.high %v580_v29, %v584_v30  ;;  %v587_v37 = vld [vmem:[%s2246_s7 + $0x50] sm:$0xff] }
 0x1b9   : > { %963 = vmatprep.subr.bf16.mxu0 %v1485_v39  ;;  %v1493_v49 = vcombine.high %v593_v42, %v597_v44  ;;  %1004 = vmatprep.subr.bf16.mxu1 %v1487_v43  ;;  %v1495_v50 = vcombine.high %v594_v45, %v598_v46  ;;  %v601_v51 = vld [vmem:[%s2246_s7 + $0xc0] sm:$0xff]  ;;  %v602_v53 = vld [vmem:[%s2246_s7 + $0xc8] sm:$0xff]  ;;  %v1492_v55 = vcombine.low %v593_v42, %v597_v44  ;;  %v575_v32 = vld [vmem:[#allocation2] sm:$0xff] }
 0x1ba   : > { %v605_v52 = vld [vmem:[%s2246_s7 + $0xe0] sm:$0xff]  ;;  %v606_v54 = vld [vmem:[%s2246_s7 + $0xe8] sm:$0xff]  ;;  %v1494_v56 = vcombine.low %v594_v45, %v598_v46  ;;  %v591_v38 = vld [vmem:[%s2246_s7 + $0x70] sm:$0xff]  ;;  %v2303_v39 = vpack.c.bf16 %v575_v32, %v575_v32  ;;  %v1480_v42 = vcombine.low %v579_v27, %v583_v28  ;;  %v1482_v43 = vcombine.low %v580_v29, %v584_v30 }
 0x1bb   : > { %v1501_v57 = vcombine.high %v601_v51, %v605_v52  ;;  %v1503_v58 = vcombine.high %v602_v53, %v606_v54  ;;  %v609_v59 = vld [vmem:[%s2246_s7 + $0x100] sm:$0xff]  ;;  %v610_v61 = vld [vmem:[%s2246_s7 + $0x108] sm:$0xff]  ;;  %v1500_v63 = vcombine.low %v601_v51, %v605_v52  ;;  %v1502_v0 = vcombine.low %v602_v53, %v606_v54  ;;  %v588_v40 = vld [vmem:[%s2246_s7 + $0x58] sm:$0xff] }
 0x1bc   : > { %964 = vmatpush1.bf16.msra.mxu0 %v1484_v47  ;;  %1005 = vmatpush1.bf16.msra.mxu1 %v1486_v48  ;;  %v613_v60 = vld [vmem:[%s2246_s7 + $0x120] sm:$0xff]  ;;  %v614_v62 = vld [vmem:[%s2246_s7 + $0x128] sm:$0xff]  ;;  %v592_v41 = vld [vmem:[%s2246_s7 + $0x78] sm:$0xff]  ;;  %v1489_v44 = vcombine.high %v587_v37, %v591_v38 }
 0x1bd   : > { %965 = vmatprep.subr.bf16.mxu0 %v1493_v49  ;;  %1006 = vmatprep.subr.bf16.mxu1 %v1495_v50  ;;  %v1509_v1 = vcombine.high %v609_v59, %v613_v60  ;;  %v1511_v2 = vcombine.high %v610_v61, %v614_v62  ;;  %v617_v3 = vld [vmem:[%s2246_s7 + $0x140] sm:$0xff]  ;;  %v618_v5 = vld [vmem:[%s2246_s7 + $0x148] sm:$0xff]  ;;  %v1508_v7 = vcombine.low %v609_v59, %v613_v60  ;;  %v595_v46 = vld [vmem:[%s2246_s7 + $0x90] sm:$0xff] }
 0x1be   : > { %v621_v4 = vld [vmem:[%s2246_s7 + $0x160] sm:$0xff]  ;;  %v622_v6 = vld [vmem:[%s2246_s7 + $0x168] sm:$0xff]  ;;  %v1510_v8 = vcombine.low %v610_v61, %v614_v62  ;;  %v1491_v45 = vcombine.high %v588_v40, %v592_v41  ;;  %v599_v47 = vld [vmem:[%s2246_s7 + $0xb0] sm:$0xff]  ;;  %v1488_v50 = vcombine.low %v587_v37, %v591_v38  ;;  %v1490_v51 = vcombine.low %v588_v40, %v592_v41 }
 0x1bf   : > { %v1517_v9 = vcombine.high %v617_v3, %v621_v4  ;;  %v1519_v10 = vcombine.high %v618_v5, %v622_v6  ;;  %v625_v11 = vld [vmem:[%s2246_s7 + $0x180] sm:$0xff]  ;;  %v626_v13 = vld [vmem:[%s2246_s7 + $0x188] sm:$0xff]  ;;  %v1516_v15 = vcombine.low %v617_v3, %v621_v4  ;;  %v1518_v16 = vcombine.low %v618_v5, %v622_v6  ;;  %v596_v48 = vld [vmem:[%s2246_s7 + $0x98] sm:$0xff] }
 0x1c0   : > { %966 = vmatpush1.bf16.msra.mxu0 %v1492_v55  ;;  %1007 = vmatpush1.bf16.msra.mxu1 %v1494_v56  ;;  %v629_v12 = vld [vmem:[%s2246_s7 + $0x1a0] sm:$0xff]  ;;  %v630_v14 = vld [vmem:[%s2246_s7 + $0x1a8] sm:$0xff]  ;;  %v600_v49 = vld [vmem:[%s2246_s7 + $0xb8] sm:$0xff]  ;;  %v1497_v52 = vcombine.high %v595_v46, %v599_v47 }
 0x1c1   : > { %967 = vmatprep.subr.bf16.mxu0 %v1501_v57  ;;  %1008 = vmatprep.subr.bf16.mxu1 %v1503_v58  ;;  %v1525_v17 = vcombine.high %v625_v11, %v629_v12  ;;  %v1527_v18 = vcombine.high %v626_v13, %v630_v14  ;;  %v633_v19 = vld [vmem:[%s2246_s7 + $0x1c0] sm:$0xff]  ;;  %v634_v21 = vld [vmem:[%s2246_s7 + $0x1c8] sm:$0xff]  ;;  %v1524_v23 = vcombine.low %v625_v11, %v629_v12  ;;  %v603_v54 = vld [vmem:[%s2246_s7 + $0xd0] sm:$0xff] }
 0x1c2   : > { %v637_v20 = vld [vmem:[%s2246_s7 + $0x1e0] sm:$0xff]  ;;  %v638_v22 = vld [vmem:[%s2246_s7 + $0x1e8] sm:$0xff]  ;;  %v1526_v24 = vcombine.low %v626_v13, %v630_v14  ;;  %v1499_v53 = vcombine.high %v596_v48, %v600_v49  ;;  %v607_v55 = vld [vmem:[%s2246_s7 + $0xf0] sm:$0xff]  ;;  %v1496_v58 = vcombine.low %v595_v46, %v599_v47  ;;  %v1498_v59 = vcombine.low %v596_v48, %v600_v49 }
 0x1c3   : > { %v1533_v25 = vcombine.high %v633_v19, %v637_v20  ;;  %v1535_v26 = vcombine.high %v634_v21, %v638_v22  ;;  %v1532_v31 = vcombine.low %v633_v19, %v637_v20  ;;  %v1534_v33 = vcombine.low %v634_v21, %v638_v22  ;;  %v604_v56 = vld [vmem:[%s2246_s7 + $0xd8] sm:$0xff]  ;;  %v611_v62 = vld [vmem:[%s2246_s7 + $0x110] sm:$0xff] }
 0x1c4   : > { %968 = vmatpush1.bf16.msra.mxu0 %v1500_v63  ;;  %1009 = vmatpush1.bf16.msra.mxu1 %v1502_v0  ;;  %v608_v57 = vld [vmem:[%s2246_s7 + $0xf8] sm:$0xff]  ;;  %v1505_v60 = vcombine.high %v603_v54, %v607_v55  ;;  %v615_v63 = vld [vmem:[%s2246_s7 + $0x130] sm:$0xff] }
 0x1c5   : > { %969 = vmatprep.subr.bf16.mxu0 %v1509_v1  ;;  %1010 = vmatprep.subr.bf16.mxu1 %v1511_v2  ;;  %v1507_v61 = vcombine.high %v604_v56, %v608_v57  ;;  %v612_v0 = vld [vmem:[%s2246_s7 + $0x118] sm:$0xff]  ;;  %v1504_v2 = vcombine.low %v603_v54, %v607_v55  ;;  %v1513_v3 = vcombine.high %v611_v62, %v615_v63  ;;  %v619_v5 = vld [vmem:[%s2246_s7 + $0x150] sm:$0xff] }
 0x1c6   : > { %v616_v1 = vld [vmem:[%s2246_s7 + $0x138] sm:$0xff]  ;;  %v623_v6 = vld [vmem:[%s2246_s7 + $0x170] sm:$0xff] }
 0x1c7   : > { %v1515_v4 = vcombine.high %v612_v0, %v616_v1  ;;  %v1521_v11 = vcombine.high %v619_v5, %v623_v6  ;;  %v627_v13 = vld [vmem:[%s2246_s7 + $0x190] sm:$0xff] }
 0x1c8   : > { %970 = vmatpush1.bf16.msra.mxu0 %v1508_v7  ;;  %1011 = vmatpush1.bf16.msra.mxu1 %v1510_v8  ;;  %v620_v7 = vld [vmem:[%s2246_s7 + $0x158] sm:$0xff]  ;;  %v631_v14 = vld [vmem:[%s2246_s7 + $0x1b0] sm:$0xff] }
 0x1c9   : > { %971 = vmatprep.subr.bf16.mxu0 %v1517_v9  ;;  %1012 = vmatprep.subr.bf16.mxu1 %v1519_v10  ;;  %v624_v8 = vld [vmem:[%s2246_s7 + $0x178] sm:$0xff]  ;;  %v1512_v9 = vcombine.low %v611_v62, %v615_v63  ;;  %v1514_v10 = vcombine.low %v612_v0, %v616_v1  ;;  %v1529_v19 = vcombine.high %v627_v13, %v631_v14  ;;  %v635_v21 = vld [vmem:[%s2246_s7 + $0x1d0] sm:$0xff] }
 0x1ca   : > { %v1523_v12 = vcombine.high %v620_v7, %v624_v8  ;;  %v639_v22 = vld [vmem:[%s2246_s7 + $0x1f0] sm:$0xff] }
 0x1cb   : > { %v1537_v27 = vcombine.high %v635_v21, %v639_v22  ;;  %v1536_v29 = vcombine.low %v635_v21, %v639_v22 }
 0x1cc   : > { %972 = vmatpush1.bf16.msra.mxu0 %v1516_v15  ;;  %1013 = vmatpush1.bf16.msra.mxu1 %v1518_v16  ;;  %v628_v15 = vld [vmem:[%s2246_s7 + $0x198] sm:$0xff] }
 0x1cd   : > { %973 = vmatprep.subr.bf16.mxu0 %v1525_v17  ;;  %1014 = vmatprep.subr.bf16.mxu1 %v1527_v18  ;;  %v632_v16 = vld [vmem:[%s2246_s7 + $0x1b8] sm:$0xff]  ;;  %v1520_v17 = vcombine.low %v619_v5, %v623_v6  ;;  %v1522_v18 = vcombine.low %v620_v7, %v624_v8 }
 0x1ce   : > { %v1531_v20 = vcombine.high %v628_v15, %v632_v16 }
 0x1d0   : > { %974 = vmatpush1.bf16.msra.mxu0 %v1524_v23  ;;  %1015 = vmatpush1.bf16.msra.mxu1 %v1526_v24  ;;  %v636_v23 = vld [vmem:[%s2246_s7 + $0x1d8] sm:$0xff] }
 0x1d1   : > { %975 = vmatprep.subr.bf16.mxu0 %v1533_v25  ;;  %1016 = vmatprep.subr.bf16.mxu1 %v1535_v26  ;;  %v640_v24 = vld [vmem:[%s2246_s7 + $0x1f8] sm:$0xff]  ;;  %v1528_v25 = vcombine.low %v627_v13, %v631_v14  ;;  %v1530_v26 = vcombine.low %v628_v15, %v632_v16 }
 0x1d2   : > { %v1539_v28 = vcombine.high %v636_v23, %v640_v24  ;;  %v1538_v30 = vcombine.low %v636_v23, %v640_v24 }
 0x1d4   : > { %976 = vmatpush1.bf16.msra.mxu0 %v1532_v31  ;;  %1017 = vmatpush1.bf16.msra.mxu1 %v1534_v33  ;;  %v1150_v31 = vlaneseq }
 0x1d5   : > { %1043 = vmatprep.subr.bf16.mxu0 %v1481_v34  ;;  %1084 = vmatprep.subr.bf16.mxu1 %v1483_v35  ;;  %v2342_v34 = vld [vmem:[%s348_s29] sm:$0xff] }
 0x1d6   : > { %v2337_v32 = vshrl.u32 %v1150_v31, 7 }
 0x1d7   : > { %994 = vmatmul.mubr.bf16.vlgmr.msra.gmra.mrb[0].mxu0 %v2303_v39  ;;  %1035 = vmatmul.mubr.bf16.vlgmr.msra.gmra.mrb[0].mxu1 %v2303_v39 }
 0x1d8   : > { %1044 = vmatpush1.bf16.msra.mxu0 %v1480_v42  ;;  %1085 = vmatpush1.bf16.msra.mxu1 %v1482_v43  ;;  %v1152_v33 = vsub.s32 0, %v2337_v32  ;;  %v1157_v35 = vsub.s32 1, %v2337_v32  ;;  %v1163_v37 = vsub.s32 2, %v2337_v32  ;;  %v1187_v5 = vsub.s32 6, %v2337_v32 }
 0x1d9   : > { %1045 = vmatprep.subr.bf16.mxu0 %v1489_v44  ;;  %1086 = vmatprep.subr.bf16.mxu1 %v1491_v45  ;;  %v1169_v44 = vsub.s32 3, %v2337_v32 }
 0x1da   : > { %1075 = vmatprep.mubr.bf16.mxu0 %v1984_v36  ;;  %1116 = vmatprep.mubr.bf16.mxu1 %v1984_v36  ;;  %v1506_v36 = vcombine.low %v604_v56, %v608_v57  ;;  %v1153_v40 = vrot.slane %v2342_v34, %v1152_v33  ;;  %v1164_v47 = vrot.slane %v2342_v34, %v1163_v37  ;;  %v1729_v37 = vld [vmem:[#allocation10] sm:$0xff] (!%p1540_p0)  }
 0x1dc   : > { %1046 = vmatpush1.bf16.msra.mxu0 %v1488_v50  ;;  %1087 = vmatpush1.bf16.msra.mxu1 %v1490_v51 }
 0x1dd   : > { %1047 = vmatprep.subr.bf16.mxu0 %v1497_v52  ;;  %1088 = vmatprep.subr.bf16.mxu1 %v1499_v53 }
 0x1e0   : > { %1048 = vmatpush1.bf16.msra.mxu0 %v1496_v58  ;;  %1089 = vmatpush1.bf16.msra.mxu1 %v1498_v59  ;;  %v1170_v58 = vrot.slane %v2342_v34, %v1169_v44  ;;  %v1736_v44 = vld [vmem:[#allocation10 + $0x38] sm:$0xff] (!%p1540_p0)  }
 0x1e1   : > { %1049 = vmatprep.subr.bf16.mxu0 %v1505_v60  ;;  %1090 = vmatprep.subr.bf16.mxu1 %v1507_v61 }
 0x1e4   : > { %1050 = vmatpush1.bf16.msra.mxu0 %v1504_v2  ;;  %1091 = vmatpush1.bf16.msra.mxu1 %v1506_v36  ;;  %v1175_v2 = vsub.s32 4, %v2337_v32  ;;  %v1181_v36 = vsub.s32 5, %v2337_v32 }
 0x1e5   : > { %1051 = vmatprep.subr.bf16.mxu0 %v1513_v3  ;;  %1092 = vmatprep.subr.bf16.mxu1 %v1515_v4 }
 0x1e6   : > { %v1176_v4 = vrot.slane %v2342_v34, %v1175_v2  ;;  %v1182_v8 = vrot.slane %v2342_v34, %v1181_v36 }
 0x1e8   : > { %1052 = vmatpush1.bf16.msra.mxu0 %v1512_v9  ;;  %1093 = vmatpush1.bf16.msra.mxu1 %v1514_v10  ;;  %v1193_v10 = vsub.s32 7, %v2337_v32 }
 0x1e9   : > { %1053 = vmatprep.subr.bf16.mxu0 %v1521_v11  ;;  %1094 = vmatprep.subr.bf16.mxu1 %v1523_v12 }
 0x1ec   : > { %1054 = vmatpush1.bf16.msra.mxu0 %v1520_v17  ;;  %1095 = vmatpush1.bf16.msra.mxu1 %v1522_v18  ;;  %v1188_v18 = vrot.slane %v2342_v34, %v1187_v5 }
 0x1ed   : > { %1055 = vmatprep.subr.bf16.mxu0 %v1529_v19  ;;  %1096 = vmatprep.subr.bf16.mxu1 %v1531_v20 }
 0x1f0   : > { %1056 = vmatpush1.bf16.msra.mxu0 %v1528_v25  ;;  %1097 = vmatpush1.bf16.msra.mxu1 %v1530_v26  ;;  %v1194_v26 = vrot.slane %v2342_v34, %v1193_v10 }
 0x1f1   : > { %1057 = vmatprep.subr.bf16.mxu0 %v1537_v27  ;;  %1098 = vmatprep.subr.bf16.mxu1 %v1539_v28 }
 0x1f4   : > { %1058 = vmatpush1.bf16.msra.mxu0 %v1536_v29  ;;  %1099 = vmatpush1.bf16.msra.mxu1 %v1538_v30 }
 0x1f7   : > { %1076 = vmatmul.mubr.bf16.vlgmr.msra.gmra.mrb[4].mxu0 %v2303_v39  ;;  %1117 = vmatmul.mubr.bf16.vlgmr.msra.gmra.mrb[4].mxu1 %v2303_v39  ;;  %v1158_v39 = vrot.slane %v2342_v34, %v1157_v35  ;;  %v1731_v34 = vld [vmem:[#allocation10 + $0x10] sm:$0xff] (!%p1540_p0)  }
 0x2aa   : > { %v995_v38 = vpop.f32.mrb[0].mxu0  ;;  %v1036_v43 = vpop.f32.mrb[0].mxu1 }
 0x2ab   : > { %vm1125_vm1 = vcmp.ge.f32.partialorder %v995_v38, 0.0  ;;  %v1133_v41 = vmul.f32 0.01, %v995_v38  ;;  %v997_v42 = vpop.f32.mrb[1].mxu0  ;;  %vm1127_vm3 = vcmp.ge.f32.partialorder %v1036_v43, 0.0  ;;  %v1038_v48 = vpop.f32.mrb[1].mxu1 }
 0x2ac   : > { %vm1126_vm2 = vcmp.ge.f32.partialorder %v997_v42, 0.0  ;;  %v1134_v45 = vmul.f32 0.01, %v997_v42  ;;  %v999_v46 = vpop.f32.mrb[2].mxu0  ;;  %v1135_v50 = vmul.f32 0.01, %v1036_v43 }
 0x2ad   : > { %v1141_v49 = vsel %vm1125_vm1, %v995_v38, %v1133_v41  ;;  %v1000_v51 = vpop.f32.mrb[3].mxu0  ;;  %vm1128_vm4 = vcmp.ge.f32.partialorder %v1038_v48, 0.0  ;;  %v1136_v52 = vmul.f32 0.01, %v1038_v48  ;;  %v1040_v55 = vpop.f32.mrb[2].mxu1  ;;  %v1985_v38 = vmov (!%p1540_p0), 0.0  }
 0x2ae   : > { %v1154_v53 = vmul.f32 %v1153_v40, %v1141_v49  ;;  %v1142_v54 = vsel %vm1126_vm2, %v997_v42, %v1134_v45  ;;  %v1143_v57 = vsel %vm1127_vm3, %v1036_v43, %v1135_v50  ;;  %v1041_v59 = vpop.f32.mrb[3].mxu1  ;;  %1586 = vmatprep.subr.bf16.mxu0 (!%p1540_p0), %v1985_v38  ;;  %v1730_v40 = vld [vmem:[#allocation10 + $0x8] sm:$0xff] (!%p1540_p0)   ;;  %1602 = vmatprep.mubr.msk.bf16.mxu0 (!%p1540_p0), %vm1986_vm10, %v1985_v38  ;;  %v1732_v41 = vld [vmem:[#allocation10 + $0x18] sm:$0xff] (!%p1540_p0)   ;;  %v1733_v42 = vld [vmem:[#allocation10 + $0x20] sm:$0xff] (!%p1540_p0)  }
 0x2af   : > { %v1159_v56 = vmul.f32 %v1158_v39, %v1142_v54  ;;  %v1165_v60 = vmul.f32 %v1164_v47, %v1143_v57  ;;  %v1144_v61 = vsel %vm1128_vm4, %v1038_v48, %v1136_v52  ;;  %1587 = vmatpush3.bf16.msra.mxu0 (!%p1540_p0), %v1729_v37  ;;  %v1734_v39 = vld [vmem:[#allocation10 + $0x28] sm:$0xff] (!%p1540_p0)   ;;  %v1735_v43 = vld [vmem:[#allocation10 + $0x30] sm:$0xff] (!%p1540_p0)   ;;  %v1541_v47 = vld [vmem:[%s2410_s6] ss:$0 sm:$0xff] (!%p1540_p0) }
 0x2b0   : > { %v1171_v0 = vmul.f32 %v1170_v58, %v1144_v61  ;;  %1588 = vmatprep.subr.bf16.mxu0 (!%p1540_p0), %v1985_v38 }
 0x2b1   : > { %v1160_v62 = vadd.f32 %v1159_v56, %v1154_v53 }
 0x2b3   : > { %v1166_v63 = vadd.f32 %v1165_v60, %v1160_v62  ;;  %1589 = vmatpush3.bf16.msra.mxu0 (!%p1540_p0), %v1730_v40 }
 0x2b4   : > { %1590 = vmatprep.subr.bf16.mxu0 (!%p1540_p0), %v1985_v38 }
 0x2b5   : > { %v1172_v1 = vadd.f32 %v1171_v0, %v1166_v63 }
 0x2b7   : > { %1591 = vmatpush3.bf16.msra.mxu0 (!%p1540_p0), %v1731_v34 }
 0x2b8   : > { %1592 = vmatprep.subr.bf16.mxu0 (!%p1540_p0), %v1985_v38 }
 0x2bb   : > { %1593 = vmatpush3.bf16.msra.mxu0 (!%p1540_p0), %v1732_v41 }
 0x2bc   : > { %1594 = vmatprep.subr.bf16.mxu0 (!%p1540_p0), %v1985_v38 }
 0x2bf   : > { %1595 = vmatpush3.bf16.msra.mxu0 (!%p1540_p0), %v1733_v42 }
 0x2c0   : > { %1596 = vmatprep.subr.bf16.mxu0 (!%p1540_p0), %v1985_v38 }
 0x2c3   : > { %1597 = vmatpush3.bf16.msra.mxu0 (!%p1540_p0), %v1734_v39 }
 0x2c4   : > { %1598 = vmatprep.subr.bf16.mxu0 (!%p1540_p0), %v1985_v38 }
 0x2c7   : > { %1599 = vmatpush3.bf16.msra.mxu0 (!%p1540_p0), %v1735_v43 }
 0x2c8   : > { %1600 = vmatprep.subr.bf16.mxu0 (!%p1540_p0), %v1985_v38 }
 0x2ca   : > { %v1077_v3 = vpop.f32.mrb[4].mxu0  ;;  %v1118_v9 = vpop.f32.mrb[4].mxu1 }
 0x2cb   : > { %vm1129_vm5 = vcmp.ge.f32.partialorder %v1077_v3, 0.0  ;;  %v1137_v6 = vmul.f32 0.01, %v1077_v3  ;;  %v1079_v7 = vpop.f32.mrb[5].mxu0  ;;  %vm1131_vm7 = vcmp.ge.f32.partialorder %v1118_v9, 0.0  ;;  %v1120_v15 = vpop.f32.mrb[5].mxu1  ;;  %1601 = vmatpush3.bf16.msra.mxu0 (!%p1540_p0), %v1736_v44 }
 0x2cc   : > { %vm1130_vm6 = vcmp.ge.f32.partialorder %v1079_v7, 0.0  ;;  %v1138_v11 = vmul.f32 0.01, %v1079_v7  ;;  %v1139_v12 = vmul.f32 0.01, %v1118_v9  ;;  %v1081_v14 = vpop.f32.mrb[6].mxu0 }
 0x2cd   : > { %v1145_v13 = vsel %vm1129_vm5, %v1077_v3, %v1137_v6  ;;  %vm1132_vm8 = vcmp.ge.f32.partialorder %v1120_v15, 0.0  ;;  %v1082_v19 = vpop.f32.mrb[7].mxu0  ;;  %v1122_v20 = vpop.f32.mrb[6].mxu1  ;;  %v1140_v23 = vmul.f32 0.01, %v1120_v15 }
 0x2ce   : > { %v1177_v16 = vmul.f32 %v1176_v4, %v1145_v13  ;;  %v1146_v17 = vsel %vm1130_vm6, %v1079_v7, %v1138_v11  ;;  %v1147_v22 = vsel %vm1131_vm7, %v1118_v9, %v1139_v12  ;;  %v1123_v24 = vpop.f32.mrb[7].mxu1 }
 0x2cf   : > { %v1183_v21 = vmul.f32 %v1182_v8, %v1146_v17  ;;  %v1148_v27 = vsel %vm1132_vm8, %v1120_v15, %v1140_v23  ;;  %v1189_v29 = vmul.f32 %v1188_v18, %v1147_v22 }
 0x2d0   : > { %v1178_v25 = vadd.f32 %v1177_v16, %v1172_v1  ;;  %v1195_v31 = vmul.f32 %v1194_v26, %v1148_v27 }
 0x2d2   : > { %v1184_v28 = vadd.f32 %v1183_v21, %v1178_v25 }
 0x2d4   : > { %v1190_v30 = vadd.f32 %v1189_v29, %v1184_v28 }
 0x2d5   : > { %1204 = sbr.rel (%p1540_p0) target bundleno = 956 (0x3bc), region = 76 }
 0x2d6   : > { %v1196_v32 = vadd.f32 %v1195_v31, %v1190_v30 }
 0x2d8   : > { %vm1197_vm9 = vcmp.ge.f32.partialorder %v1196_v32, 0.0  ;;  %v1198_v33 = vmul.f32 0.0001, %v1196_v32 }
 0x2da   : > { %v1199_v35 = vsel %vm1197_vm9, %v1196_v32, %v1198_v33 }
 0x2db   : > { %1200 = vst [vmem:[#allocation2] sm:$0xff] %v1199_v35 }
 0x2e2   : > { %v1205_v45 = vld [vmem:[#allocation2] sm:$0xff] }
 0x2e3   : > { %v1206_v46 = vpack.c.bf16 %v1205_v45, %v1205_v45 }
 0x2e5   : > { %1603 = vmatmul.mubr.bf16.vlgmr.msra.gmra.mrb[0].mxu0 %v1206_v46 }
 0x3b8   : > { %v1312_v48 = vpop.f32.mrb[0].mxu0 }
 0x3b9   : > { %v1313_v49 = vadd.f32 %v1541_v47, %v1312_v48  ;;  %v1604_v50 = vpop.f32.mrb[1].mxu0 }
 0x3ba   : > { %v1315_v51 = vpop.f32.mrb[2].mxu0 }
 0x3bb   : > { %1318 = vst [vmem:[#allocation11] sm:$0xff] %v1313_v49  ;;  %v1605_v52 = vpop.f32.mrb[3].mxu0 }
 0x3bc PF: > { %p1650_p12 = scmp.eq.s32.totalorder %s2057_s30, 1  ;;  %s1987_s1 = smov [#allocation11]  }
 0x3bd   : > { %s1328_s11 = sshll.u32 %s1987_s1, 4  ;;  %s1329_s11 = int_to_ptr.vmem [resolvable:$true] %s1328_s11 }
 0x3be   : > { %s1881_s13 = scalar_lea.vmem %s1329_s11, 128  ;;  %p1888_p9 = scmp.lt.s32.totalorder %s1329_s11, %s1329_s11 }
 0x3bf   : > { %p1882_p2 = scmp.ne.s32.totalorder %s1329_s11, %s1881_s13  ;;  %p1889_p3 = scmp.lt.s32.totalorder %s1881_s13, %s1881_s13 }
 0x3c1   : > { %p1883_p10 = pnand %p1882_p2, %p1650_p12  ;;  %p1890_p6 = por %p1889_p3, %p1888_p9 }
 0x3c3   : > { %p1884_p13 = pneg %p1883_p10 }
 0x3c5   : > { %p1891_p1 = pnand %p1890_p6, %p1884_p13 }
 0x3c7   : > { %1894 = shalt.err (!%p1891_p1)
}
 0x3c8   : > { %s2455_s20 = sld [smem:[#allocation23_spill]] }
 0x3ce   : > { %s1895_s18 = scalar_lea.hbm %s2455_s20, 128 }
 0x3cf   : > { %p1896_p4 = scmp.ne.s32.totalorder %s2455_s20, %s1895_s18  ;;  %p1901_p7 = scmp.lt.u32.totalorder %s1895_s18, %s2455_s20 }
 0x3d1   : > { %p1897_p8 = pnand %p1896_p4, %p1650_p12 }
 0x3d3   : > { %p1898_p5 = pneg %p1897_p8 }
 0x3d5   : > { %p1903_p11 = pnand %p1901_p7, %p1898_p5 }
 0x3d7   : > { %1906 = shalt.err (!%p1903_p11)
}
 0x3d8   : > { %1623 = dma.vmem_to_hbm [thread:$0]  (%p1650_p12), %s1329_s11, 128, %s2455_s20, [#allocation5]  }
 0x3d9   : > { %1948 = dma.done.wait (%p1650_p12), [#allocation5], 128  }
 0x3da   : > { %1950 = vsyncadd (%p1650_p12), [#allocation5], 4294967168 }
 0x3db PF: > { %s2456_s23 = sld [smem:[#allocation17_spill]]  ;;  %s2457_s21 = sld [smem:[#allocation19_spill]] }
 0x3dc   : > { %s2458_s10 = sld [smem:[#allocation18_spill]]  ;;  %s2459_s24 = smov %s1957_s25 }
 0x3dd   : > { %s2460_s25 = smov %s1961_s26  ;;  %s2462_s27 = smov %s1969_s28 }
 0x3e1   : > { %s20_s29 = sadd.s32 1, %s2456_s23   ;;  %s2461_s26 = smov %s2457_s21 }
 0x3e2   : > { %p17_p0 = scmp.ge.s32.totalorder %s20_s29, 4   ;;  %s2463_s28 = smov %s2458_s10 }
 0x3e4   :  { %19 = sbr.rel (!%p17_p0) target bundleno = 10 (0xa), region = 117 }
 0x3eb   :  { %1341 = vsyncpa [#allocation4], 1 }
 0x3ec   :  { %1343 = vsyncpa [#allocation4 + $0x1], 1 }
 0x3ed   :  { %1344 = vsyncpa [#allocation7], 1 }
 0x3ee   :  { %1345 = vsyncpa [#allocation5], 1 }
 0x3ef   :  { %1347 = vsyncpa [#allocation5 + $0x1], 1 }

</bundles_post_ra>
